<compile_context>
chip_gen: v7x
topology: tpu7x:2x2x1
jax: 0.10.0
libtpu: 0.0.40
codegen_flags: <defaults>
</compile_context>

<pallas_src>
import jax
import jax.numpy as jnp
from jax.experimental import pallas as pl
from jax.experimental.pallas import tpu as pltpu


_MAX_DMA_CHUNKS = 4   # a few overlapped DMA streams is plenty for a pure copy
_MAX_LANE = 8192      # lane-width cap (multiple of 128) for the flattened slab


def _pick_slab_shape(total_elems):
    """Pick a lane-dense 2-D (rows, lane) view of `total_elems` contiguous elems."""
    cap = min(_MAX_LANE, (total_elems // 128) * 128)
    lane = None
    c = cap
    while c >= 128:
        if total_elems % c == 0:
            lane = c
            break
        c -= 128
    if lane is None:
        # total not a multiple of 128; the DMA copies raw bytes, so a single
        # long row is still correct (no vreg path involved).
        lane = total_elems
    return total_elems // lane, lane


def _make_dma_copy_kernel(row_splits):
    """Kernel: chunked, overlapped HBM->HBM DMA copy (no VMEM staging)."""
    n = len(row_splits) - 1

    def kernel(x_hbm, o_hbm, sems):
        copies = []
        for i in range(n):
            lo, hi = row_splits[i], row_splits[i + 1]
            cp = pltpu.make_async_copy(x_hbm.at[lo:hi], o_hbm.at[lo:hi], sems.at[i])
            cp.start()
            copies.append(cp)
        for cp in copies:
            cp.wait()

    return kernel


def custom_rearrange(x):
    """x: (B, L, C, H, W) -> (B*L, C, H, W)  ('b l c h w -> (b l) c h w')."""
    B, L, C, H, W = x.shape
    M = B * L
    total = M * C * H * W
    itemsize = jnp.dtype(x.dtype).itemsize

    rows, lane = _pick_slab_shape(total)
    x2 = x.reshape(rows, lane)  # metadata-only flatten of contiguous dims (under jit)

    # Static, roughly equal row splits -> a few overlapped DMA streams.
    n_chunks = max(1, min(_MAX_DMA_CHUNKS, rows))
    base, rem = divmod(rows, n_chunks)
    splits = [0]
    for i in range(n_chunks):
        splits.append(splits[-1] + base + (1 if i < rem else 0))

    out2 = pl.pallas_call(
        _make_dma_copy_kernel(splits),
        out_shape=jax.ShapeDtypeStruct((rows, lane), x.dtype),
        in_specs=[pl.BlockSpec(memory_space=pl.ANY)],
        out_specs=pl.BlockSpec(memory_space=pl.ANY),
        scratch_shapes=[pltpu.SemaphoreType.DMA((n_chunks,))],
        cost_estimate=pl.CostEstimate(
            flops=0,
            transcendentals=0,
            bytes_accessed=2 * total * itemsize,
        ),
    )(x2)

    # Metadata-only reshape back to the module's output convention.
    return out2.reshape(M, C, H, W)


if __name__ == "__main__":
    # Small shapes consistent with the module's 'b l c h w' input convention.
    B, L, C, H, W = 2, 3, 4, 16, 16
    key = jax.random.PRNGKey(0)
    x = jax.random.normal(key, (B, L, C, H, W), dtype=jnp.float32)

    fn = jax.jit(custom_rearrange)
    out = fn(x)
    out = jax.block_until_ready(out)

    # Reference semantics: rearrange 'b l c h w -> (b l) c h w' == reshape.
    ref = x.reshape(B * L, C, H, W)
    assert out.shape == (B * L, C, H, W)
    assert out.dtype == x.dtype
    assert jnp.array_equal(out, ref)

    print("KERNEL_OK")
</pallas_src>

<mosaic_0001>
module attributes {stable_mosaic.version = 11 : i64} {
  func.func @kernel(%arg0: memref<1x6144xf32, #tpu.memory_space<any>>, %arg1: memref<1x6144xf32, #tpu.memory_space<any>>, %arg2: memref<1x!tpu.dma_semaphore, #tpu.memory_space<semaphore_mem>>) attributes {dimension_semantics = [], scalar_prefetch = 0 : i64, scratch_operands = 1 : i64, tpu.core_type = #tpu.core_type<tc>} {
    %c0_i32 = arith.constant 0 : i32
    %c0_i32_0 = arith.constant 0 : i32
    %c0_i32_1 = arith.constant 0 : i32
    %0 = tpu.memref_slice %arg0[%c0_i32_0, %c0_i32_1] : memref<1x6144xf32, #tpu.memory_space<any>> -> memref<1x6144xf32, #tpu.memory_space<any>>
    %c0_i32_2 = arith.constant 0 : i32
    %c0_i32_3 = arith.constant 0 : i32
    %1 = tpu.memref_slice %arg1[%c0_i32_2, %c0_i32_3] : memref<1x6144xf32, #tpu.memory_space<any>> -> memref<1x6144xf32, #tpu.memory_space<any>>
    %2 = tpu.memref_slice %arg2[%c0_i32] : memref<1x!tpu.dma_semaphore, #tpu.memory_space<semaphore_mem>> -> memref<1x!tpu.dma_semaphore, #tpu.memory_space<semaphore_mem>>
    %3 = tpu.memref_squeeze %2 : memref<1x!tpu.dma_semaphore, #tpu.memory_space<semaphore_mem>> -> memref<!tpu.dma_semaphore, #tpu.memory_space<semaphore_mem>>
    tpu.enqueue_dma source(%0 : memref<1x6144xf32, #tpu.memory_space<any>>) target(%1 : memref<1x6144xf32, #tpu.memory_space<any>>) target_semaphore(%3 : memref<!tpu.dma_semaphore, #tpu.memory_space<semaphore_mem>>)
    %c0_i32_4 = arith.constant 0 : i32
    %c0_i32_5 = arith.constant 0 : i32
    %c0_i32_6 = arith.constant 0 : i32
    %4 = tpu.memref_slice %arg0[%c0_i32_5, %c0_i32_6] : memref<1x6144xf32, #tpu.memory_space<any>> -> memref<1x6144xf32, #tpu.memory_space<any>>
    %c0_i32_7 = arith.constant 0 : i32
    %c0_i32_8 = arith.constant 0 : i32
    %5 = tpu.memref_slice %arg1[%c0_i32_7, %c0_i32_8] : memref<1x6144xf32, #tpu.memory_space<any>> -> memref<1x6144xf32, #tpu.memory_space<any>>
    %6 = tpu.memref_slice %arg2[%c0_i32_4] : memref<1x!tpu.dma_semaphore, #tpu.memory_space<semaphore_mem>> -> memref<1x!tpu.dma_semaphore, #tpu.memory_space<semaphore_mem>>
    %7 = tpu.memref_squeeze %6 : memref<1x!tpu.dma_semaphore, #tpu.memory_space<semaphore_mem>> -> memref<!tpu.dma_semaphore, #tpu.memory_space<semaphore_mem>>
    tpu.wait_dma2 semaphore(%7 : memref<!tpu.dma_semaphore, #tpu.memory_space<semaphore_mem>>) src(%4 : memref<1x6144xf32, #tpu.memory_space<any>>) dst(%5 : memref<1x6144xf32, #tpu.memory_space<any>>)
    return
  }
}

</mosaic_0001>

<bundles_post_ra>
// kernel: custom_rearrange.1
= control target key start
LH: loop header
LB: loop body
LE: loop exit
PB: predicated region body
PF: predicated region fallthrough
CT: control target
= control target key end

     0   :  { %s124_s0 = inlined_call_operand.vmem [shape: f32[1,6144], index: 0, kind: input, shape index: {}]   ;;  %s125_s1 = inlined_call_operand.vmem [shape: f32[1,6144], index: 1, kind: output, shape index: {}]  }
   0x1   :  { %v38_v0 = vld [vmem:[%s124_s0] sm:$0xff]  ;;  %v40_v1 = vld [vmem:[%s124_s0 + $0x8] sm:$0xff]  ;;  %v42_v2 = vld [vmem:[%s124_s0 + $0x10] sm:$0xff] }
   0x2   :  { %39 = vst [vmem:[%s125_s1] sm:$0xff] %v38_v0  ;;  %41 = vst [vmem:[%s125_s1 + $0x8] sm:$0xff] %v40_v1  ;;  %v44_v3 = vld [vmem:[%s124_s0 + $0x18] sm:$0xff]  ;;  %v46_v4 = vld [vmem:[%s124_s0 + $0x20] sm:$0xff] }
   0x3   :  { %43 = vst [vmem:[%s125_s1 + $0x10] sm:$0xff] %v42_v2  ;;  %v48_v5 = vld [vmem:[%s124_s0 + $0x28] sm:$0xff]  ;;  %45 = vst [vmem:[%s125_s1 + $0x18] sm:$0xff] %v44_v3 }
   0x4   :  { %47 = vst [vmem:[%s125_s1 + $0x20] sm:$0xff] %v46_v4  ;;  %49 = vst [vmem:[%s125_s1 + $0x28] sm:$0xff] %v48_v5 }
   0x5   :  { %57 = vsyncadd [#allocation2], 768 }
   0x6   :  { %76 = dma.done.wait [#allocation2], 768 }
   0x7   :  { %77 = vsyncadd [#allocation2], 4294966528 }
   0x8   :  { %61 = vsyncmov [#allocation2] }
   0xb   :  { %s62_s30 = vpop.sfrf %61 }
   0xc   :  { %p75_p0 = scmp.ne.s32.totalorder %s62_s30, 0 }
   0xe   :  { %66 = shalt.err (%p75_p0)  }

</bundles_post_ra>
